<compile_context>
chip_gen: v6e
topology: v6e:2x2x1
jax: 0.10.0
libtpu: 0.0.40
codegen_flags: <defaults>
</compile_context>

<pallas_src>
import functools

import jax
import jax.numpy as jnp
from jax.experimental import pallas as pl
from jax.experimental.pallas import tpu as pltpu

IN_CHANNELS = 1024  # fixed by the module (cnn1 in_channels=1024)


def _predictor_kernel(x_ref, w1_ref, vecs_ref, w2_ref, o_ref, *, eps):
    # x_ref: (tm, 1024) in the input dtype, w1_ref: (1024, H) bf16,
    # w2_ref: (H, H) bf16, vecs_ref: (4, H) f32 rows = [b1, gamma, beta, b2].
    vecs = vecs_ref[...]
    b1 = vecs[0:1, :]
    gamma = vecs[1:2, :]
    beta = vecs[2:3, :]
    b2 = vecs[3:4, :]

    # Cast the streamed rows to the MXU dtype in-VMEM (cheap VPU work, hidden
    # under the next tile's DMA); avoids a separate HBM-round-trip cast.
    xb = x_ref[...].astype(w1_ref.dtype)

    # Conv1d #1 (k=1) -> bf16 MXU matmul, f32 accumulation.
    h = jnp.dot(xb, w1_ref[...], preferred_element_type=jnp.float32) + b1

    # LayerNorm over hidden dim, all statistics in f32.
    mu = jnp.mean(h, axis=-1, keepdims=True)
    d = h - mu
    var = jnp.mean(d * d, axis=-1, keepdims=True)
    inv = jax.lax.rsqrt(var + eps)
    n = d * (inv * gamma) + beta

    # Conv1d #2 (k=1) -> bf16 MXU matmul, f32 accumulation.
    out = jnp.dot(n.astype(w2_ref.dtype), w2_ref[...],
                  preferred_element_type=jnp.float32) + b2

    o_ref[...] = out.astype(o_ref.dtype)


def bert_word_embeddings_predictor(x, w1, b1, gamma, beta, w2, b2,
                                    *, eps=1e-12, tm=512,
                                    compute_dtype=jnp.bfloat16):
    """x: (B, L, 1024).  w1: (1024, H), w2: (H, H) stored as (in, out)
    (i.e. the transpose of the PyTorch conv weight).  Returns (B, L, H)."""
    B, L, C = x.shape
    assert C == IN_CHANNELS
    H = w1.shape[1]
    assert tm % 128 == 0, "tm must be a multiple of 128 (multiples of 256 ideal)"

    M = B * L
    # Row tile: never larger than M (so no block exceeds the array), multiple
    # of 8 sublanes when possible; ragged tail handled by a partial last block.
    if M >= tm:
        tm_eff = tm
    elif M >= 8:
        tm_eff = (M // 8) * 8
    else:
        tm_eff = M
    grid_m = pl.cdiv(M, tm_eff)

    x2d = x.reshape(M, C)  # contiguous reshape: no HBM copy.

    # Pack the four per-channel vectors into one (4, H) f32 operand.
    vecs = jnp.concatenate(
        [b1.reshape(1, H), gamma.reshape(1, H),
         beta.reshape(1, H), b2.reshape(1, H)], axis=0).astype(jnp.float32)

    kernel = functools.partial(_predictor_kernel, eps=eps)

    out2d = pl.pallas_call(
        kernel,
        out_shape=jax.ShapeDtypeStruct((M, H), x.dtype),
        grid_spec=pltpu.PrefetchScalarGridSpec(
            num_scalar_prefetch=0,
            grid=(grid_m,),
            in_specs=[
                pl.BlockSpec((tm_eff, C), lambda i: (i, 0)),  # x rows (streamed)
                pl.BlockSpec((C, H), lambda i: (0, 0)),       # W1 (resident)
                pl.BlockSpec((4, H), lambda i: (0, 0)),       # [b1,gamma,beta,b2]
                pl.BlockSpec((H, H), lambda i: (0, 0)),       # W2 (resident)
            ],
            out_specs=pl.BlockSpec((tm_eff, H), lambda i: (i, 0)),
        ),
        compiler_params=pltpu.CompilerParams(
            dimension_semantics=("parallel",)),
    )(x2d, w1.astype(compute_dtype), vecs, w2.astype(compute_dtype))

    return out2d.reshape(B, L, H)


def _reference(x, w1, b1, gamma, beta, w2, b2, eps=1e-12):
    # Pure-JAX f32 reference of the module forward.
    h = jnp.einsum("blc,ch->blh", x, w1) + b1.reshape(1, 1, -1)
    mu = jnp.mean(h, axis=-1, keepdims=True)
    var = jnp.mean((h - mu) ** 2, axis=-1, keepdims=True)
    n = (h - mu) / jnp.sqrt(var + eps) * gamma.reshape(1, 1, -1) \
        + beta.reshape(1, 1, -1)
    return jnp.einsum("blh,hk->blk", n, w2) + b2.reshape(1, 1, -1)


if __name__ == "__main__":
    H = 128        # config.hidden_size = 128 (lane-aligned)
    eps = 1e-12    # config.layer_norm_eps

    key = jax.random.PRNGKey(0)
    kx, k1, kb1, k2, kb2, kx2 = jax.random.split(key, 6)

    # Deterministic synthetic parameters (shapes from the module __init__).
    # Stored as (in, out) so the kernel does x @ W; equals PyTorch conv weight^T.
    w1 = jax.random.normal(k1, (IN_CHANNELS, H), dtype=jnp.float32) * 0.02
    b1 = jax.random.normal(kb1, (1, H), dtype=jnp.float32) * 0.02
    w2 = jax.random.normal(k2, (H, H), dtype=jnp.float32) * 0.02
    b2 = jax.random.normal(kb2, (1, H), dtype=jnp.float32) * 0.02
    gamma = jnp.ones((1, H), dtype=jnp.float32)    # nn.LayerNorm default init
    beta = jnp.zeros((1, H), dtype=jnp.float32)

    # Case 1: small shape (B=2, L=8) -> single full tile.
    x = jax.random.normal(kx, (2, 8, IN_CHANNELS), dtype=jnp.float32)
    out = bert_word_embeddings_predictor(x, w1, b1, gamma, beta, w2, b2, eps=eps)
    out = jax.block_until_ready(out)
    ref = _reference(x, w1, b1, gamma, beta, w2, b2, eps=eps)
    assert out.shape == (2, 8, H)
    # bf16 compute path vs f32 reference: loosened tolerance.
    assert jnp.allclose(out, ref, atol=2e-2, rtol=2e-2)

    # Case 2: M = B*L not a multiple of the tile (exercises the partial-block path).
    x2 = jax.random.normal(kx2, (3, 100, IN_CHANNELS), dtype=jnp.float32)
    out2 = bert_word_embeddings_predictor(x2, w1, b1, gamma, beta, w2, b2, eps=eps)
    out2 = jax.block_until_ready(out2)
    ref2 = _reference(x2, w1, b1, gamma, beta, w2, b2, eps=eps)
    assert out2.shape == (3, 100, H)
    assert jnp.allclose(out2, ref2, atol=2e-2, rtol=2e-2)

    print("KERNEL_OK")
</pallas_src>

<mosaic_0001>
module attributes {stable_mosaic.version = 11 : i64} {
  func.func @_predictor_kernel(%arg0: i32, %arg1: memref<16x1024xf32, #tpu.memory_space<vmem>>, %arg2: memref<1024x128xbf16, #tpu.memory_space<vmem>>, %arg3: memref<4x128xf32, #tpu.memory_space<vmem>>, %arg4: memref<128x128xbf16, #tpu.memory_space<vmem>>, %arg5: memref<16x128xf32, #tpu.memory_space<vmem>>) attributes {dimension_semantics = [#tpu.dimension_semantics<parallel>], iteration_bounds = array<i64: 1>, scalar_prefetch = 0 : i64, scratch_operands = 0 : i64, tpu.core_type = #tpu.core_type<tc>, window_params = [{transform_indices = @transform_0, window_bounds = array<i64: 16, 1024>}, {pipeline_mode = #tpu.pipeline_mode<synchronous>, transform_indices = @transform_1, window_bounds = array<i64: 1024, 128>}, {pipeline_mode = #tpu.pipeline_mode<synchronous>, transform_indices = @transform_2, window_bounds = array<i64: 4, 128>}, {pipeline_mode = #tpu.pipeline_mode<synchronous>, transform_indices = @transform_3, window_bounds = array<i64: 128, 128>}, {transform_indices = @transform_4, window_bounds = array<i64: 16, 128>}]} {
    %c0 = arith.constant 0 : index
    %c0_0 = arith.constant 0 : index
    %0 = vector.load %arg3[%c0, %c0_0] : memref<4x128xf32, #tpu.memory_space<vmem>>, vector<4x128xf32>
    %1 = vector.extract_strided_slice %0 {offsets = [0, 0], sizes = [1, 128], strides = [1, 1]} : vector<4x128xf32> to vector<1x128xf32>
    %2 = vector.extract_strided_slice %0 {offsets = [1, 0], sizes = [1, 128], strides = [1, 1]} : vector<4x128xf32> to vector<1x128xf32>
    %3 = vector.extract_strided_slice %0 {offsets = [2, 0], sizes = [1, 128], strides = [1, 1]} : vector<4x128xf32> to vector<1x128xf32>
    %4 = vector.extract_strided_slice %0 {offsets = [3, 0], sizes = [1, 128], strides = [1, 1]} : vector<4x128xf32> to vector<1x128xf32>
    %c0_1 = arith.constant 0 : index
    %c0_2 = arith.constant 0 : index
    %5 = vector.load %arg1[%c0_1, %c0_2] : memref<16x1024xf32, #tpu.memory_space<vmem>>, vector<16x1024xf32>
    %6 = arith.truncf %5 : vector<16x1024xf32> to vector<16x1024xbf16>
    %c0_3 = arith.constant 0 : index
    %c0_4 = arith.constant 0 : index
    %7 = vector.load %arg2[%c0_3, %c0_4] : memref<1024x128xbf16, #tpu.memory_space<vmem>>, vector<1024x128xbf16>
    %cst = arith.constant dense<0.000000e+00> : vector<16x128xf32>
    %8 = tpu.matmul %6, %7, %cst {dimension_numbers = #tpu.dot_dimension_numbers<[1], [0], [0], [1], [0, 0, 1, 1], [], []>} : vector<16x1024xbf16>, vector<1024x128xbf16>, vector<16x128xf32> -> vector<16x128xf32>
    %9 = vector.broadcast %1 : vector<1x128xf32> to vector<16x128xf32>
    %10 = arith.addf %8, %9 : vector<16x128xf32>
    %cst_5 = arith.constant dense<0.000000e+00> : vector<16xf32>
    %11 = vector.multi_reduction <add>, %10, %cst_5 [1] : vector<16x128xf32> to vector<16xf32>
    %12 = vector.shape_cast %11 : vector<16xf32> to vector<16x1xf32>
    %cst_6 = arith.constant 1.280000e+02 : f32
    %13 = vector.broadcast %cst_6 : f32 to vector<16x1xf32>
    %14 = arith.divf %12, %13 : vector<16x1xf32>
    %15 = vector.broadcast %14 : vector<16x1xf32> to vector<16x128xf32>
    %16 = arith.subf %10, %15 : vector<16x128xf32>
    %17 = arith.mulf %16, %16 : vector<16x128xf32>
    %cst_7 = arith.constant dense<0.000000e+00> : vector<16xf32>
    %18 = vector.multi_reduction <add>, %17, %cst_7 [1] : vector<16x128xf32> to vector<16xf32>
    %19 = vector.shape_cast %18 : vector<16xf32> to vector<16x1xf32>
    %cst_8 = arith.constant 1.280000e+02 : f32
    %20 = vector.broadcast %cst_8 : f32 to vector<16x1xf32>
    %21 = arith.divf %19, %20 : vector<16x1xf32>
    %cst_9 = arith.constant 9.99999996E-13 : f32
    %22 = vector.broadcast %cst_9 : f32 to vector<16x1xf32>
    %23 = arith.addf %21, %22 : vector<16x1xf32>
    %24 = math.rsqrt %23 : vector<16x1xf32>
    %25 = vector.broadcast %24 : vector<16x1xf32> to vector<16x128xf32>
    %26 = vector.broadcast %2 : vector<1x128xf32> to vector<16x128xf32>
    %27 = arith.mulf %25, %26 : vector<16x128xf32>
    %28 = arith.mulf %16, %27 : vector<16x128xf32>
    %29 = vector.broadcast %3 : vector<1x128xf32> to vector<16x128xf32>
    %30 = arith.addf %28, %29 : vector<16x128xf32>
    %31 = arith.truncf %30 : vector<16x128xf32> to vector<16x128xbf16>
    %c0_10 = arith.constant 0 : index
    %c0_11 = arith.constant 0 : index
    %32 = vector.load %arg4[%c0_10, %c0_11] : memref<128x128xbf16, #tpu.memory_space<vmem>>, vector<128x128xbf16>
    %cst_12 = arith.constant dense<0.000000e+00> : vector<16x128xf32>
    %33 = tpu.matmul %31, %32, %cst_12 {dimension_numbers = #tpu.dot_dimension_numbers<[1], [0], [0], [1], [0, 0, 1, 1], [], []>} : vector<16x128xbf16>, vector<128x128xbf16>, vector<16x128xf32> -> vector<16x128xf32>
    %34 = vector.broadcast %4 : vector<1x128xf32> to vector<16x128xf32>
    %35 = arith.addf %33, %34 : vector<16x128xf32>
    %c0_13 = arith.constant 0 : index
    %c0_14 = arith.constant 0 : index
    %36 = vector.load %arg5[%c0_13, %c0_14] : memref<16x128xf32, #tpu.memory_space<vmem>>, vector<16x128xf32>
    tpu.vector_store %arg5[%c0_13, %c0_14], %35 {strides = array<i32>} : memref<16x128xf32, #tpu.memory_space<vmem>>, vector<16x128xf32>,
    return
  }
  func.func @transform_0(%arg0: i32) -> (i32, i32) {
    %c0_i32 = arith.constant 0 : i32
    %c0_i32_0 = arith.constant 0 : i32
    return %arg0, %c0_i32 : i32, i32
  }
  func.func @transform_1(%arg0: i32) -> (i32, i32) {
    %c0_i32 = arith.constant 0 : i32
    %c0_i32_0 = arith.constant 0 : i32
    %c0_i32_1 = arith.constant 0 : i32
    return %c0_i32, %c0_i32_0 : i32, i32
  }
  func.func @transform_2(%arg0: i32) -> (i32, i32) {
    %c0_i32 = arith.constant 0 : i32
    %c0_i32_0 = arith.constant 0 : i32
    %c0_i32_1 = arith.constant 0 : i32
    return %c0_i32, %c0_i32_0 : i32, i32
  }
  func.func @transform_3(%arg0: i32) -> (i32, i32) {
    %c0_i32 = arith.constant 0 : i32
    %c0_i32_0 = arith.constant 0 : i32
    %c0_i32_1 = arith.constant 0 : i32
    return %c0_i32, %c0_i32_0 : i32, i32
  }
  func.func @transform_4(%arg0: i32) -> (i32, i32) {
    %c0_i32 = arith.constant 0 : i32
    %c0_i32_0 = arith.constant 0 : i32
    return %arg0, %c0_i32 : i32, i32
  }
}

</mosaic_0001>

<bundles_post_ra>
// kernel: tpu_custom_call.1
= control target key start
LH: loop header
LB: loop body
LE: loop exit
PB: predicated region body
PF: predicated region fallthrough
CT: control target
= control target key end

     0   :  { %9 = vsyncpa [#allocation3], 0  ;;  %s1399_s0 = inlined_call_operand.hbm [shape: f32[16,1024], index: 0, kind: input, shape index: {}]   ;;  %s1400_s1 = inlined_call_operand.hbm [shape: bf16[1024,128], index: 1, kind: input, shape index: {}]   ;;  %s1401_s2 = inlined_call_operand.hbm [shape: f32[4,128], index: 2, kind: input, shape index: {}]   ;;  %s1402_s3 = inlined_call_operand.hbm [shape: bf16[128,128], index: 3, kind: input, shape index: {}]   ;;  %s1403_s4 = inlined_call_operand.hbm [shape: f32[16,128], index: 4, kind: output, shape index: {}]  }
   0x1   :  { %10 = vsyncpa [#allocation6], 0 }
   0x2   :  { %11 = vsyncpa [#allocation9], 0 }
   0x3   :  { %12 = vsyncpa [#allocation4], 0  ;;  %s1328_s15 = smov [#allocation5]  }
   0x4   :  { %s30_s16 = sshll.u32 %s1328_s15, 4  ;;  %s31_s16 = int_to_ptr.vmem [resolvable:$true] %s30_s16 }
   0x5   :  { %s1228_s17 = scalar_lea.vmem %s31_s16, 8192  ;;  %p1233_p1 = scmp.lt.s32.totalorder %s31_s16, %s31_s16 }
   0x6   :  { %p1229_p0 = scmp.ne.s32.totalorder %s31_s16, %s1228_s17  ;;  %p1234_p2 = scmp.lt.s32.totalorder %s1228_s17, %s1228_s17 }
   0x8   :  { %p1235_p3 = por %p1234_p2, %p1233_p1 }
   0xa   :  { %p1236_p4 = pnand %p1235_p3, %p1229_p0 }
   0xc   :  { %1239 = shalt.err (!%p1236_p4)
}
   0xd   :  { %s1329_s18 = smov 64   ;;  %s1330_s19 = smov 4  }
   0xe   :  { %36 = dma.hbm_to_vmem [thread:$0]  %s1400_s1, 8192, %s31_s16, [#allocation6], %s1329_s18, %s1329_s18, %s1330_s19  }
   0xf   :  { %s1331_s22 = smov [#allocation2]  }
  0x10   :  { %s18_s23 = sshll.u32 %s1331_s22, 4  ;;  %s19_s23 = int_to_ptr.vmem [resolvable:$true] %s18_s23 }
  0x11   :  { %s1248_s24 = scalar_lea.vmem %s19_s23, 2048  ;;  %p1253_p6 = scmp.lt.s32.totalorder %s19_s23, %s19_s23 }
  0x12   :  { %p1249_p5 = scmp.ne.s32.totalorder %s19_s23, %s1248_s24  ;;  %p1254_p7 = scmp.lt.s32.totalorder %s1248_s24, %s1248_s24 }
  0x14   :  { %p1255_p8 = por %p1254_p7, %p1253_p6 }
  0x16   :  { %p1256_p9 = pnand %p1255_p8, %p1249_p5 }
  0x18   :  { %1259 = shalt.err (!%p1256_p9)
}
  0x19   :  { %s1332_s25 = smov 1024   ;;  %s1333_s28 = smov [#allocation7]  }
  0x1a   :  { %24 = dma.hbm_to_vmem [thread:$0]  %s1399_s0, 2048, %s19_s23, [#allocation3], %s1332_s25, %s1332_s25, %s1329_s18  }
  0x1b   :  { %s43_s29 = sshll.u32 %s1333_s28, 4  ;;  %s1334_s1 = smov [#allocation8]   ;;  %s44_s29 = int_to_ptr.vmem [resolvable:$true] %s43_s29 }
  0x1c   :  { %s52_s30 = sshll.u32 %s1334_s1, 4  ;;  %s1268_s5 = scalar_lea.vmem %s44_s29, 64  ;;  %s53_s30 = int_to_ptr.vmem [resolvable:$true] %s52_s30 }
  0x1d   :  { %p1269_p10 = scmp.ne.s32.totalorder %s44_s29, %s1268_s5  ;;  %p1273_p11 = scmp.lt.s32.totalorder %s44_s29, %s44_s29 }
  0x1e   :  { %p1274_p12 = scmp.lt.s32.totalorder %s1268_s5, %s1268_s5 }
  0x20   :  { %p1275_p13 = por %p1274_p12, %p1273_p11 }
  0x22   :  { %p1276_p0 = pnand %p1275_p13, %p1269_p10 }
  0x24   :  { %1279 = shalt.err (!%p1276_p0)
}
  0x25   :  { %46 = dma.hbm_to_vmem [thread:$0]  %s1401_s2, 64, %s44_s29, [#allocation6]  }
  0x26   :  { %s1288_s8 = scalar_lea.vmem %s53_s30, 1024  ;;  %p1293_p2 = scmp.lt.s32.totalorder %s53_s30, %s53_s30 }
  0x27   :  { %p1289_p1 = scmp.ne.s32.totalorder %s53_s30, %s1288_s8  ;;  %p1294_p3 = scmp.lt.s32.totalorder %s1288_s8, %s1288_s8 }
  0x29   :  { %p1295_p4 = por %p1294_p3, %p1293_p2 }
  0x2b   :  { %p1296_p5 = pnand %p1295_p4, %p1289_p1 }
  0x2d   :  { %1299 = shalt.err (!%p1296_p5)
}
  0x2e   :  { %58 = dma.hbm_to_vmem [thread:$0]  %s1402_s3, 1024, %s53_s30, [#allocation9], %s1329_s18, %s1329_s18, %s1330_s19  }
  0x2f   :  { %1320 = dma.done.wait [#allocation3], 2048  }
  0x30   :  { %1321 = vsyncadd [#allocation3], 4294965248 }
  0x31   :  { %1322 = dma.done.wait [#allocation6], 8256  }
  0x32   :  { %1323 = vsyncadd [#allocation6], 4294959040 }
  0x33   :  { %1324 = dma.done.wait [#allocation9], 1024  }
  0x34   :  { %1325 = vsyncadd [#allocation9], 4294966272  ;;  %v1144_v0 = vld [vmem:[#allocation5 + $0x78] sm:$0xff]   ;;  %v1148_v4 = vld [vmem:[#allocation5 + $0x70] sm:$0xff]   ;;  %vm1336_vm0 = vmmov 0   ;;  %s1337_s2 = smov [#allocation10]  }
  0x35   :  { %v1145_v1 = vld [vmem:[#allocation5 + $0xf8] sm:$0xff]   ;;  %1015 = vmatprep.subr.bf16.mxu0 %v1144_v0  ;;  %v1149_v5 = vld [vmem:[#allocation5 + $0xf0] sm:$0xff]   ;;  %v1152_v8 = vld [vmem:[#allocation5 + $0x68] sm:$0xff]   ;;  %s929_s3 = sshll.u32 %s1337_s2, 4  ;;  %s930_s3 = int_to_ptr.vmem [resolvable:$true] %s929_s3 }
  0x36   :  { %v1146_v2 = vld [vmem:[#allocation5 + $0x38] sm:$0xff]   ;;  %1037 = vmatprep.subr.bf16.mxu1 %v1145_v1  ;;  %v1150_v6 = vld [vmem:[#allocation5 + $0x30] sm:$0xff]   ;;  %v1153_v9 = vld [vmem:[#allocation5 + $0xe8] sm:$0xff]   ;;  %s1300_s10 = scalar_lea.vmem %s930_s3, 256  ;;  %p1305_p7 = scmp.lt.s32.totalorder %s930_s3, %s930_s3 }
  0x37   :  { %v1147_v3 = vld [vmem:[#allocation5 + $0xb8] sm:$0xff]   ;;  %1016 = vmatpush3.bf16.msra.mxu0 %v1146_v2  ;;  %v1151_v7 = vld [vmem:[#allocation5 + $0xb0] sm:$0xff]   ;;  %v1154_v10 = vld [vmem:[#allocation5 + $0x28] sm:$0xff]   ;;  %p1301_p6 = scmp.ne.s32.totalorder %s930_s3, %s1300_s10  ;;  %p1306_p8 = scmp.lt.s32.totalorder %s1300_s10, %s1300_s10 }
  0x38   :  { %1038 = vmatpush3.bf16.msra.mxu1 %v1147_v3  ;;  %1017 = vmatprep.subr.bf16.mxu0 %v1148_v4  ;;  %v1155_v11 = vld [vmem:[#allocation5 + $0xa8] sm:$0xff]   ;;  %v1156_v12 = vld [vmem:[#allocation5 + $0x60] sm:$0xff]   ;;  %v1160_v16 = vld [vmem:[#allocation5 + $0x58] sm:$0xff]  }
  0x39   :  { %1039 = vmatprep.subr.bf16.mxu1 %v1149_v5  ;;  %v1157_v13 = vld [vmem:[#allocation5 + $0xe0] sm:$0xff]   ;;  %v1161_v17 = vld [vmem:[#allocation5 + $0xd8] sm:$0xff]   ;;  %v1164_v20 = vld [vmem:[#allocation5 + $0x50] sm:$0xff]   ;;  %p1307_p9 = por %p1306_p8, %p1305_p7 }
  0x3a   :  { %v1158_v14 = vld [vmem:[#allocation5 + $0x20] sm:$0xff]   ;;  %v1162_v18 = vld [vmem:[#allocation5 + $0x18] sm:$0xff]   ;;  %v1165_v21 = vld [vmem:[#allocation5 + $0xd0] sm:$0xff]  }
  0x3b   :  { %1018 = vmatpush3.bf16.msra.mxu0 %v1150_v6  ;;  %v1159_v15 = vld [vmem:[#allocation5 + $0xa0] sm:$0xff]   ;;  %v1163_v19 = vld [vmem:[#allocation5 + $0x98] sm:$0xff]   ;;  %v1166_v22 = vld [vmem:[#allocation5 + $0x10] sm:$0xff]   ;;  %p1308_p10 = pnand %p1307_p9, %p1301_p6 }
  0x3c   :  { %1040 = vmatpush3.bf16.msra.mxu1 %v1151_v7  ;;  %1019 = vmatprep.subr.bf16.mxu0 %v1152_v8  ;;  %v1167_v23 = vld [vmem:[#allocation5 + $0x90] sm:$0xff]   ;;  %v1168_v24 = vld [vmem:[#allocation5 + $0x48] sm:$0xff]   ;;  %v1172_v28 = vld [vmem:[#allocation5 + $0x40] sm:$0xff]  }
  0x3d   :  { %1041 = vmatprep.subr.bf16.mxu1 %v1153_v9  ;;  %v1169_v25 = vld [vmem:[#allocation5 + $0xc8] sm:$0xff]   ;;  %v1173_v29 = vld [vmem:[#allocation5 + $0xc0] sm:$0xff]   ;;  %v76_v34 = vld [vmem:[#allocation2 + $0x18] sm:$0xff] }
  0x3e   :  { %v1170_v26 = vld [vmem:[#allocation5 + $0x8] sm:$0xff]   ;;  %v1174_v30 = vld [vmem:[#allocation5] sm:$0xff]   ;;  %v84_v36 = vld [vmem:[#allocation2 + $0x58] sm:$0xff] }
  0x3f   :  { %1020 = vmatpush3.bf16.msra.mxu0 %v1154_v10  ;;  %v1171_v27 = vld [vmem:[#allocation5 + $0x88] sm:$0xff]   ;;  %v1175_v31 = vld [vmem:[#allocation5 + $0x80] sm:$0xff]   ;;  %v92_v39 = vpack.c.bf16 %v84_v36, %v76_v34  ;;  %v75_v41 = vld [vmem:[#allocation2 + $0x10] sm:$0xff] }
  0x40   :  { %1042 = vmatpush3.bf16.msra.mxu1 %v1155_v11  ;;  %1021 = vmatprep.subr.bf16.mxu0 %v1156_v12  ;;  %v74_v32 = vld [vmem:[#allocation2 + $0x8] sm:$0xff]  ;;  %v73_v37 = vld [vmem:[#allocation2] sm:$0xff]  ;;  %v83_v42 = vld [vmem:[#allocation2 + $0x50] sm:$0xff] }
  0x41   :  { %1043 = vmatprep.subr.bf16.mxu1 %v1157_v13  ;;  %v82_v33 = vld [vmem:[#allocation2 + $0x48] sm:$0xff]  ;;  %v81_v38 = vld [vmem:[#allocation2 + $0x40] sm:$0xff]  ;;  %v91_v43 = vpack.c.bf16 %v83_v42, %v75_v41  ;;  %v1176_v44 = vld [vmem:[#allocation5 + $0x178] sm:$0xff]   ;;  %686 = vmatprep.mubr.bf16.mxu1 %v92_v39 }
  0x42   :  { %v90_v35 = vpack.c.bf16 %v82_v33, %v74_v32  ;;  %v89_v40 = vpack.c.bf16 %v81_v38, %v73_v37  ;;  %v1177_v45 = vld [vmem:[#allocation5 + $0x1f8] sm:$0xff]   ;;  %v1180_v48 = vld [vmem:[#allocation5 + $0x170] sm:$0xff]   ;;  %v1184_v52 = vld [vmem:[#allocation5 + $0x168] sm:$0xff]  }
  0x43   :  { %1022 = vmatpush3.bf16.msra.mxu0 %v1158_v14  ;;  %v1178_v46 = vld [vmem:[#allocation5 + $0x138] sm:$0xff]   ;;  %v1181_v49 = vld [vmem:[#allocation5 + $0x1f0] sm:$0xff]   ;;  %v1185_v53 = vld [vmem:[#allocation5 + $0x1e8] sm:$0xff]  }
  0x44   :  { %1044 = vmatpush3.bf16.msra.mxu1 %v1159_v15  ;;  %1023 = vmatprep.subr.bf16.mxu0 %v1160_v16  ;;  %v1179_v47 = vld [vmem:[#allocation5 + $0x1b8] sm:$0xff]   ;;  %v1182_v50 = vld [vmem:[#allocation5 + $0x130] sm:$0xff]   ;;  %v1186_v54 = vld [vmem:[#allocation5 + $0x128] sm:$0xff]  }
  0x45   :  { %1045 = vmatprep.subr.bf16.mxu1 %v1161_v17  ;;  %645 = vmatprep.mubr.bf16.mxu0 %v90_v35  ;;  %v1183_v51 = vld [vmem:[#allocation5 + $0x1b0] sm:$0xff]   ;;  %v1187_v55 = vld [vmem:[#allocation5 + $0x1a8] sm:$0xff]   ;;  %v1188_v56 = vld [vmem:[#allocation5 + $0x160] sm:$0xff]  }
  0x46   :  { %v1189_v57 = vld [vmem:[#allocation5 + $0x1e0] sm:$0xff]   ;;  %v1192_v60 = vld [vmem:[#allocation5 + $0x158] sm:$0xff]   ;;  %v1196_v0 = vld [vmem:[#allocation5 + $0x150] sm:$0xff]  }
  0x47   :  { %1024 = vmatpush3.bf16.msra.mxu0 %v1162_v18  ;;  %v1190_v58 = vld [vmem:[#allocation5 + $0x120] sm:$0xff]   ;;  %v1193_v61 = vld [vmem:[#allocation5 + $0x1d8] sm:$0xff]   ;;  %v1197_v1 = vld [vmem:[#allocation5 + $0x1d0] sm:$0xff]  }
  0x48   :  { %1046 = vmatpush3.bf16.msra.mxu1 %v1163_v19  ;;  %1025 = vmatprep.subr.bf16.mxu0 %v1164_v20  ;;  %v1191_v59 = vld [vmem:[#allocation5 + $0x1a0] sm:$0xff]   ;;  %v1194_v62 = vld [vmem:[#allocation5 + $0x118] sm:$0xff]   ;;  %v1198_v2 = vld [vmem:[#allocation5 + $0x110] sm:$0xff]  }
  0x49   :  { %1047 = vmatprep.subr.bf16.mxu1 %v1165_v21  ;;  %v1195_v63 = vld [vmem:[#allocation5 + $0x198] sm:$0xff]   ;;  %v1199_v3 = vld [vmem:[#allocation5 + $0x190] sm:$0xff]   ;;  %v1200_v4 = vld [vmem:[#allocation5 + $0x148] sm:$0xff]  }
  0x4a   :  { %v1201_v5 = vld [vmem:[#allocation5 + $0x1c8] sm:$0xff]   ;;  %v1204_v8 = vld [vmem:[#allocation5 + $0x140] sm:$0xff]   ;;  %v80_v14 = vld [vmem:[#allocation2 + $0x38] sm:$0xff] }
  0x4b   :  { %1026 = vmatpush3.bf16.msra.mxu0 %v1166_v22  ;;  %v1202_v6 = vld [vmem:[#allocation5 + $0x108] sm:$0xff]   ;;  %v1205_v9 = vld [vmem:[#allocation5 + $0x1c0] sm:$0xff]   ;;  %v88_v15 = vld [vmem:[#allocation2 + $0x78] sm:$0xff] }
  0x4c   :  { %1048 = vmatpush3.bf16.msra.mxu1 %v1167_v23  ;;  %1027 = vmatprep.subr.bf16.mxu0 %v1168_v24  ;;  %v1203_v7 = vld [vmem:[#allocation5 + $0x188] sm:$0xff]   ;;  %v1206_v10 = vld [vmem:[#allocation5 + $0x100] sm:$0xff]   ;;  %v96_v17 = vpack.c.bf16 %v88_v15, %v80_v14  ;;  %v79_v20 = vld [vmem:[#allocation2 + $0x30] sm:$0xff]  ;;  %v225_v24 = vlaneseq }
  0x4d   :  { %1049 = vmatprep.subr.bf16.mxu1 %v1169_v25  ;;  %v1207_v11 = vld [vmem:[#allocation5 + $0x180] sm:$0xff]   ;;  %v78_v12 = vld [vmem:[#allocation2 + $0x28] sm:$0xff]  ;;  %v87_v22 = vld [vmem:[#allocation2 + $0x70] sm:$0xff] }
  0x4e   :  { %v86_v13 = vld [vmem:[#allocation2 + $0x68] sm:$0xff]  ;;  %v77_v18 = vld [vmem:[#allocation2 + $0x20] sm:$0xff]  ;;  %v95_v23 = vpack.c.bf16 %v87_v22, %v79_v20 }
  0x4f   :  { %1028 = vmatpush3.bf16.msra.mxu0 %v1170_v26  ;;  %v94_v16 = vpack.c.bf16 %v86_v13, %v78_v12  ;;  %v85_v19 = vld [vmem:[#allocation2 + $0x60] sm:$0xff]  ;;  %v1214_v12 = vld [vmem:[#allocation8 + $0x8] sm:$0xff]  }
  0x50   :  { %1050 = vmatpush3.bf16.msra.mxu1 %v1171_v27  ;;  %1029 = vmatprep.subr.bf16.mxu0 %v1172_v28  ;;  %v93_v21 = vpack.c.bf16 %v85_v19, %v77_v18  ;;  %v1384_v27 = vshrl.u32 %v225_v24, 7  ;;  %v1215_v13 = vld [vmem:[#allocation8] sm:$0xff]  }
  0x51   :  { %1051 = vmatprep.subr.bf16.mxu1 %v1173_v29 }
  0x52   :  { %v227_v29 = vsub.s32 0, %v1384_v27  ;;  %v800_v20 = vsub.s32 1, %v1384_v27  ;;  %v808_v24 = vsub.s32 2, %v1384_v27 }
  0x53   :  { %1030 = vmatpush3.bf16.msra.mxu0 %v1174_v30 }
  0x54   :  { %1052 = vmatpush3.bf16.msra.mxu1 %v1175_v31  ;;  %1059 = vmatprep.subr.bf16.mxu0 %v1176_v44  ;;  %v1387_v31 = vld [vmem:[#allocation7] sm:$0xf] }
  0x55   :  { %1081 = vmatprep.subr.bf16.mxu1 %v1177_v45  ;;  %v228_v33 = vrot.slane %v1387_v31, %v227_v29  ;;  %v809_v29 = vrot.slane %v1387_v31, %v808_v24 }
  0x56   :  { %646 = vmatmul.mubr.bf16.vlgmr.msra.gmra.mxu0 %v89_v40 }
  0x57   :  { %687 = vmatmul.mubr.bf16.vlgmr.msra.gmra.mxu1 %v91_v43  ;;  %1060 = vmatpush3.bf16.msra.mxu0 %v1178_v46 }
  0x58   :  { %1082 = vmatpush3.bf16.msra.mxu1 %v1179_v47  ;;  %1061 = vmatprep.subr.bf16.mxu0 %v1180_v48 }
  0x59   :  { %1083 = vmatprep.subr.bf16.mxu1 %v1181_v49  ;;  %727 = vmatprep.mubr.bf16.mxu0 %v94_v16 }
  0x5a   :  { %768 = vmatprep.mubr.bf16.mxu1 %v96_v17 }
  0x5b   :  { %1062 = vmatpush3.bf16.msra.mxu0 %v1182_v50 }
  0x5c   :  { %1084 = vmatpush3.bf16.msra.mxu1 %v1183_v51  ;;  %1063 = vmatprep.subr.bf16.mxu0 %v1184_v52 }
  0x5d   :  { %1085 = vmatprep.subr.bf16.mxu1 %v1185_v53 }
  0x5f   :  { %1064 = vmatpush3.bf16.msra.mxu0 %v1186_v54 }
  0x60   :  { %1086 = vmatpush3.bf16.msra.mxu1 %v1187_v55  ;;  %1065 = vmatprep.subr.bf16.mxu0 %v1188_v56 }
  0x61   :  { %1087 = vmatprep.subr.bf16.mxu1 %v1189_v57 }
  0x63   :  { %1066 = vmatpush3.bf16.msra.mxu0 %v1190_v58 }
  0x64   :  { %1088 = vmatpush3.bf16.msra.mxu1 %v1191_v59  ;;  %1067 = vmatprep.subr.bf16.mxu0 %v1192_v60 }
  0x65   :  { %1089 = vmatprep.subr.bf16.mxu1 %v1193_v61  ;;  %v1208_v61 = vld [vmem:[#allocation8 + $0x38] sm:$0xff]  }
  0x67   :  { %1068 = vmatpush3.bf16.msra.mxu0 %v1194_v62  ;;  %v1335_v62 = vmov 0.0  }
  0x68   :  { %1090 = vmatpush3.bf16.msra.mxu1 %v1195_v63  ;;  %1069 = vmatprep.subr.bf16.mxu0 %v1196_v0 }
  0x69   :  { %1091 = vmatprep.subr.bf16.mxu1 %v1197_v1 }
  0x6b   :  { %1070 = vmatpush3.bf16.msra.mxu0 %v1198_v2 }
  0x6c   :  { %1092 = vmatpush3.bf16.msra.mxu1 %v1199_v3  ;;  %1071 = vmatprep.subr.bf16.mxu0 %v1200_v4 }
  0x6d   :  { %1093 = vmatprep.subr.bf16.mxu1 %v1201_v5 }
  0x6f   :  { %1072 = vmatpush3.bf16.msra.mxu0 %v1202_v6 }
  0x70   :  { %1094 = vmatpush3.bf16.msra.mxu1 %v1203_v7  ;;  %1073 = vmatprep.subr.bf16.mxu0 %v1204_v8  ;;  %v1209_v7 = vld [vmem:[#allocation8 + $0x30] sm:$0xff]   ;;  %v1210_v8 = vld [vmem:[#allocation8 + $0x28] sm:$0xff]  }
  0x71   :  { %1095 = vmatprep.subr.bf16.mxu1 %v1205_v9  ;;  %v1211_v9 = vld [vmem:[#allocation8 + $0x20] sm:$0xff]  }
  0x73   :  { %1074 = vmatpush3.bf16.msra.mxu0 %v1206_v10  ;;  %v1212_v10 = vld [vmem:[#allocation8 + $0x18] sm:$0xff]  }
  0x74   :  { %1096 = vmatpush3.bf16.msra.mxu1 %v1207_v11  ;;  %1112 = vmatprep.subr.bf16.mxu0 %v1335_v62  ;;  %v1213_v11 = vld [vmem:[#allocation8 + $0x10] sm:$0xff]  }
  0x76   :  { %728 = vmatmul.mubr.bf16.vlgmr.msra.gmra.mxu0 %v93_v21  ;;  %v801_v21 = vrot.slane %v1387_v31, %v800_v20 }
  0x77   :  { %769 = vmatmul.mubr.bf16.vlgmr.msra.gmra.mxu1 %v95_v23  ;;  %1113 = vmatpush3.bf16.msra.mxu0 %v1208_v61 }
  0x78   :  { %1114 = vmatprep.subr.bf16.mxu0 %v1335_v62  ;;  %1128 = vmatprep.mubr.msk.bf16.mxu0 %vm1336_vm0, %v1335_v62 }
  0x7b   :  { %1115 = vmatpush3.bf16.msra.mxu0 %v1209_v7 }
  0x7c   :  { %1116 = vmatprep.subr.bf16.mxu0 %v1335_v62 }
  0x7f   :  { %1117 = vmatpush3.bf16.msra.mxu0 %v1210_v8 }
  0x80   :  { %1118 = vmatprep.subr.bf16.mxu0 %v1335_v62 }
  0x83   :  { %1119 = vmatpush3.bf16.msra.mxu0 %v1211_v9 }
  0x84   :  { %1120 = vmatprep.subr.bf16.mxu0 %v1335_v62 }
  0x87   :  { %1121 = vmatpush3.bf16.msra.mxu0 %v1212_v10 }
  0x88   :  { %1122 = vmatprep.subr.bf16.mxu0 %v1335_v62 }
  0x8b   :  { %1123 = vmatpush3.bf16.msra.mxu0 %v1213_v11 }
  0x8c   :  { %1124 = vmatprep.subr.bf16.mxu0 %v1335_v62 }
  0x8f   :  { %1125 = vmatpush3.bf16.msra.mxu0 %v1214_v12 }
  0x90   :  { %1126 = vmatprep.subr.bf16.mxu0 %v1335_v62 }
  0x93   :  { %1127 = vmatpush3.bf16.msra.mxu0 %v1215_v13 }
 0x116   :  { %v1031_v25 = vpop.f32.mrf.mxu0 }
 0x117   :  { %v1053_v26 = vpop.f32.mrf.mxu1 }
 0x118   :  { %v1032_v28 = vpop.f32.mrf.mxu0 }
 0x119   :  { %v1054_v30 = vpop.f32.mrf.mxu1  ;;  %v1033_v34 = vadd.f32 %v1032_v28, %v1031_v25 }
 0x11a   :  { %v1034_v32 = vpop.f32.mrf.mxu0  ;;  %v1055_v38 = vadd.f32 %v1054_v30, %v1053_v26 }
 0x11b   :  { %v1056_v35 = vpop.f32.mrf.mxu1  ;;  %v648_v37 = vadd.f32 %v1033_v34, %v228_v33 }
 0x11c   :  { %v1035_v36 = vpop.f32.mrf.mxu0 }
 0x11d   :  { %v1036_v39 = vadd.f32 %v1035_v36, %v1034_v32  ;;  %v1057_v40 = vpop.f32.mrf.mxu1  ;;  %v689_v44 = vadd.f32 %v1055_v38, %v648_v37 }
 0x11e   :  { %v1058_v49 = vadd.f32 %v1057_v40, %v1056_v35  ;;  %v831_v35 = vsub.s32 3, %v1384_v27 }
 0x11f   :  { %v651_v45 = vadd.f32 %v1036_v39, %v228_v33 }
 0x120   :  { %v832_v36 = vrot.slane %v1387_v31, %v831_v35 }
 0x121   :  { %v692_v54 = vadd.f32 %v1058_v49, %v651_v45 }
 0x136   :  { %v1075_v41 = vpop.f32.mrf.mxu0 }
 0x137   :  { %v1097_v42 = vpop.f32.mrf.mxu1 }
 0x138   :  { %v1076_v43 = vpop.f32.mrf.mxu0 }
 0x139   :  { %v1077_v46 = vadd.f32 %v1076_v43, %v1075_v41  ;;  %v1098_v47 = vpop.f32.mrf.mxu1 }
 0x13a   :  { %v1078_v48 = vpop.f32.mrf.mxu0  ;;  %v1099_v51 = vadd.f32 %v1098_v47, %v1097_v42 }
 0x13b   :  { %v730_v50 = vadd.f32 %v1077_v46, %v689_v44  ;;  %v1100_v52 = vpop.f32.mrf.mxu1 }
 0x13c   :  { %v1079_v53 = vpop.f32.mrf.mxu0 }
 0x13d   :  { %v1080_v55 = vadd.f32 %v1079_v53, %v1078_v48  ;;  %v1101_v56 = vpop.f32.mrf.mxu1  ;;  %v771_v57 = vadd.f32 %v1099_v51, %v730_v50 }
 0x13e   :  { %v1102_v59 = vadd.f32 %v1101_v56, %v1100_v52 }
 0x13f   :  { %v733_v58 = vadd.f32 %v1080_v55, %v692_v54  ;;  %777 = vadd.xlane.f32.xlu0 %v771_v57 }
 0x141   :  { %v774_v60 = vadd.f32 %v1102_v59, %v733_v58 }
 0x143   :  { %779 = vadd.xlane.f32.xlu0 %v774_v60 }
 0x1c8   :  { %v778_v63 = vpop.xlane.xlu0 %777 }
 0x1c9   :  { %v782_v0 = vmul.f32 0.0078125, %v778_v63 }
 0x1cb   :  { %v784_v1 = vsub.f32 %v771_v57, %v782_v0 }
 0x1cc   :  { %v780_v2 = vpop.xlane.xlu0 %779 }
 0x1cd   :  { %v783_v3 = vmul.f32 0.0078125, %v780_v2  ;;  %v786_v4 = vmul.f32 %v784_v1, %v784_v1 }
 0x1cf   :  { %v785_v5 = vsub.f32 %v774_v60, %v783_v3  ;;  %788 = vadd.xlane.f32.xlu1 %v786_v4 }
 0x1d1   :  { %v787_v6 = vmul.f32 %v785_v5, %v785_v5 }
 0x1d3   :  { %790 = vadd.xlane.f32.xlu1 %v787_v6 }
 0x258   :  { %v789_v14 = vpop.xlane.xlu1 %788 }
 0x259   :  { %v792_v15 = vmul.f32 0.0078125, %v789_v14 }
 0x25b   :  { %v794_v16 = vadd.f32 1e-12, %v792_v15 }
 0x25c   :  { %v791_v17 = vpop.xlane.xlu1 %790 }
 0x25d   :  { %1216 = vrsqrt.f32 %v794_v16  ;;  %v793_v18 = vmul.f32 0.0078125, %v791_v17 }
 0x25f   :  { %v795_v19 = vadd.f32 1e-12, %v793_v18 }
 0x261   :  { %1218 = vrsqrt.f32 %v795_v19 }
 0x26a   :  { %v1217_v22 = vpop.eup %1216 }
 0x26b   :  { %v802_v23 = vmul.f32 %v1217_v22, %v801_v21 }
 0x26d   :  { %v804_v28 = vmul.f32 %v802_v23, %v784_v1 }
 0x26e   :  { %v1219_v25 = vpop.eup %1218 }
 0x26f   :  { %v803_v26 = vmul.f32 %v1219_v25, %v801_v21  ;;  %v810_v32 = vadd.f32 %v809_v29, %v804_v28 }
 0x271   :  { %v805_v30 = vmul.f32 %v803_v26, %v785_v5 }
 0x273   :  { %v811_v33 = vadd.f32 %v809_v29, %v805_v30 }
 0x275   :  { %v812_v34 = vpack.c.bf16 %v811_v33, %v810_v32 }
 0x277   :  { %1129 = vmatmul.mubr.bf16.vlgmr.msra.gmra.mxu0 %v812_v34 }
 0x337   :  { %v915_v37 = vpop.f32.mrf.mxu0 }
 0x338   :  { %v916_v38 = vadd.f32 %v915_v37, %v832_v36 }
 0x339   :  { %v1130_v39 = vpop.f32.mrf.mxu0 }
 0x33a   :  { %922 = vst [vmem:[#allocation10] sm:$0xff] %v916_v38 }
 0x33b   :  { %v918_v40 = vpop.f32.mrf.mxu0 }
 0x33c   :  { %v919_v41 = vadd.f32 %v918_v40, %v832_v36 }
 0x33d   :  { %v1131_v42 = vpop.f32.mrf.mxu0 }
 0x33e   :  { %923 = vst [vmem:[#allocation10 + $0x8] sm:$0xff] %v919_v41 }
 0x33f   :  { %1311 = shalt.err (!%p1308_p10)
}
 0x340   :  { %s1338_s11 = smov 128   ;;  %s1339_s12 = smov 8  }
 0x341   :  { %935 = dma.vmem_to_hbm [thread:$0]  %s930_s3, 256, %s1403_s4, [#allocation4], %s1338_s11, %s1338_s11, %s1339_s12  }
 0x342   :  { %1326 = dma.done.wait [#allocation4], 256  }
 0x343   :  { %1327 = vsyncadd [#allocation4], 4294967040 }
 0x344   :  { %939 = vsyncpa [#allocation3], 1 }
 0x345   :  { %940 = vsyncpa [#allocation6], 1 }
 0x346   :  { %941 = vsyncpa [#allocation9], 1 }
 0x347   :  { %942 = vsyncpa [#allocation4], 1 }

</bundles_post_ra>
